<compile_context>
chip_gen: v7x
topology: tpu7x:2x2x1
jax: 0.10.0
libtpu: 0.0.40
codegen_flags: <defaults>
</compile_context>

<pallas_src>
import jax
import jax.numpy as jnp
from jax.experimental import pallas as pl
from jax.experimental.pallas import tpu as pltpu


def linear_group_kernel(x_ref, wg_ref, b_ref, o_ref):
    # x_ref : (tile_r, 4*g)  VMEM  -- g batch rows per "group row", lane-dense
    # wg_ref: (4*g,   g)     VMEM  -- kron(I_g, w), resident across grid steps
    # b_ref : (1, 1)         SMEM  -- bias scalar
    # o_ref : (tile_r, g)    VMEM  -- one output element per batch row
    acc = jnp.dot(
        x_ref[...],
        wg_ref[...],
        preferred_element_type=jnp.float32,
        precision=jax.lax.Precision.HIGHEST,
    )
    o_ref[...] = (acc + b_ref[0, 0]).astype(o_ref.dtype)


def net_3_forward(x, weight, bias, *, min_pallas_rows=8192,
                  max_block_bytes=4 * 1024 * 1024):
    """Forward pass of Net_3 (fc1 = Linear(4, 1)).  x: (B, 4) -> (B, 1)."""
    B, in_f = x.shape
    out_f = weight.shape[0]  # 1

    # Lane-density of the free reshape: pack g batch rows per "group row".
    g = None
    for cand in (128, 32, 8):
        if B % cand == 0:
            g = cand
            break

    if B < min_pallas_rows or g is None:
        # Tiny batches (or B not a multiple of 8): fixed pallas_call/dispatch
        # overhead exceeds the whole op; XLA's fused GEMV is already optimal.
        out = (x.astype(jnp.float32) @ weight.astype(jnp.float32).T
               + bias.astype(jnp.float32))
        return out.astype(x.dtype)

    R = B // g
    lane_w = in_f * g  # 4*g

    # Free (contiguous, row-major) reshapes -- no extra HBM pass.
    x_r = x.reshape(R, lane_w)
    w_col = weight.astype(jnp.float32).reshape(in_f, out_f)      # (4, 1)
    wg = jnp.kron(jnp.eye(g, dtype=jnp.float32), w_col)          # (4*g, g)
    b2 = bias.astype(jnp.float32).reshape(1, 1)

    # Tile the group-row axis.  Budget ~max_block_bytes of VMEM per step for
    # (x tile + out tile), accounting for lane padding to 128, so the
    # double-buffered working set stays well inside every generation's
    # scoped-VMEM default (no vmem_limit_bytes needed).
    itemsize = jnp.dtype(x.dtype).itemsize
    lanes_pad = -(-lane_w // 128) * 128
    vmem_row_bytes = (lanes_pad + 128) * itemsize
    tile_r = max(8, (max_block_bytes // vmem_row_bytes) // 8 * 8)
    if R >= 16:
        # Prefer >=2 grid steps so v7x's two TensorCores both get work.
        half = ((R + 1) // 2 + 7) // 8 * 8
        tile_r = min(tile_r, half)
    tile_r = min(tile_r, R)  # tile_r is a multiple of 8 or equals R (legal)

    grid = (pl.cdiv(R, tile_r),)

    out_r = pl.pallas_call(
        linear_group_kernel,
        out_shape=jax.ShapeDtypeStruct((R, g), x.dtype),
        grid=grid,
        in_specs=[
            pl.BlockSpec((tile_r, lane_w), lambda i: (i, 0)),   # x tile
            pl.BlockSpec((lane_w, g), lambda i: (0, 0)),        # Wg (resident)
            pl.BlockSpec(memory_space=pltpu.MemorySpace.SMEM),  # bias scalar
        ],
        out_specs=pl.BlockSpec((tile_r, g), lambda i: (i, 0)),
        compiler_params=pltpu.CompilerParams(
            dimension_semantics=("parallel",),
        ),
    )(x_r, wg, b2)

    return out_r.reshape(B, out_f)


if __name__ == "__main__":
    key = jax.random.PRNGKey(0)
    k_x1, k_w, k_b, k_x2, k_x3 = jax.random.split(key, 5)

    in_features, out_features = 4, 1

    # Deterministic synthetic parameters (PyTorch default Linear init style).
    bound = 1.0 / (in_features ** 0.5)
    weight = jax.random.uniform(
        k_w, (out_features, in_features), jnp.float32, -bound, bound
    )
    bias = jax.random.uniform(k_b, (out_features,), jnp.float32, -bound, bound)

    def ref_fn(xx):
        return xx @ weight.T + bias

    # 1) Tiny batch, forced through the Pallas path (g=8 grouping, single block).
    x1 = jax.random.normal(k_x1, (8, in_features), jnp.float32)
    o1 = jax.block_until_ready(net_3_forward(x1, weight, bias, min_pallas_rows=0))
    assert o1.shape == (8, out_features)
    assert jnp.allclose(o1, ref_fn(x1), atol=1e-5, rtol=1e-5)

    # 2) Batch divisible by 128: lane-dense g=128 path.  A small block budget
    #    forces a multi-step cdiv grid with a partial tail block.
    B2 = 128 * 37  # 4736 rows -> R = 37 group rows, tile_r = 8 -> 5 grid steps
    x2 = jax.random.normal(k_x2, (B2, in_features), jnp.float32)
    o2 = jax.block_until_ready(
        net_3_forward(x2, weight, bias, min_pallas_rows=0, max_block_bytes=8 * 2048)
    )
    assert o2.shape == (B2, out_features)
    assert jnp.allclose(o2, ref_fn(x2), atol=1e-5, rtol=1e-5)

    # 3) Default dispatch: small batch takes the XLA fast path.
    x3 = jax.random.normal(k_x3, (64, in_features), jnp.float32)
    o3 = jax.block_until_ready(net_3_forward(x3, weight, bias))
    assert o3.shape == (64, out_features)
    assert jnp.allclose(o3, ref_fn(x3), atol=1e-5, rtol=1e-5)

    print("KERNEL_OK")
</pallas_src>

<mosaic_0001>
module attributes {stable_mosaic.version = 11 : i64} {
  func.func @linear_group_kernel(%arg0: i32, %arg1: memref<1x32xf32, #tpu.memory_space<vmem>>, %arg2: memref<32x8xf32, #tpu.memory_space<vmem>>, %arg3: memref<1x1xf32, #tpu.memory_space<smem>>, %arg4: memref<1x8xf32, #tpu.memory_space<vmem>>) attributes {dimension_semantics = [#tpu.dimension_semantics<parallel>], iteration_bounds = array<i64: 1>, scalar_prefetch = 0 : i64, scratch_operands = 0 : i64, tpu.core_type = #tpu.core_type<tc>, window_params = [{transform_indices = @transform_0, window_bounds = array<i64: 1, 32>}, {pipeline_mode = #tpu.pipeline_mode<synchronous>, transform_indices = @transform_1, window_bounds = array<i64: 32, 8>}, {transform_indices = @transform_2, window_bounds = array<i64: 1, 1>}, {transform_indices = @transform_3, window_bounds = array<i64: 1, 8>}]} {
    %c0 = arith.constant 0 : index
    %c0_0 = arith.constant 0 : index
    %0 = vector.load %arg1[%c0, %c0_0] : memref<1x32xf32, #tpu.memory_space<vmem>>, vector<1x32xf32>
    %c0_1 = arith.constant 0 : index
    %c0_2 = arith.constant 0 : index
    %1 = vector.load %arg2[%c0_1, %c0_2] : memref<32x8xf32, #tpu.memory_space<vmem>>, vector<32x8xf32>
    %cst = arith.constant dense<0.000000e+00> : vector<1x8xf32>
    %2 = tpu.matmul %0, %1, %cst {dimension_numbers = #tpu.dot_dimension_numbers<[1], [0], [0], [1], [0, 0, 1, 1], [], []>, precision = #tpu.contract_precision<fp32>} : vector<1x32xf32>, vector<32x8xf32>, vector<1x8xf32> -> vector<1x8xf32>
    %c0_3 = arith.constant 0 : index
    %c0_4 = arith.constant 0 : index
    %3 = memref.load %arg3[%c0_3, %c0_4] : memref<1x1xf32, #tpu.memory_space<smem>>
    %4 = vector.broadcast %3 : f32 to vector<1x8xf32>
    %5 = arith.addf %2, %4 : vector<1x8xf32>
    %c0_5 = arith.constant 0 : index
    %c0_6 = arith.constant 0 : index
    %6 = vector.load %arg4[%c0_5, %c0_6] : memref<1x8xf32, #tpu.memory_space<vmem>>, vector<1x8xf32>
    tpu.vector_store %arg4[%c0_5, %c0_6], %5 {strides = array<i32>} : memref<1x8xf32, #tpu.memory_space<vmem>>, vector<1x8xf32>,
    return
  }
  func.func @transform_0(%arg0: i32) -> (i32, i32) {
    %c0_i32 = arith.constant 0 : i32
    %c0_i32_0 = arith.constant 0 : i32
    return %arg0, %c0_i32 : i32, i32
  }
  func.func @transform_1(%arg0: i32) -> (i32, i32) {
    %c0_i32 = arith.constant 0 : i32
    %c0_i32_0 = arith.constant 0 : i32
    %c0_i32_1 = arith.constant 0 : i32
    return %c0_i32, %c0_i32_0 : i32, i32
  }
  func.func @transform_2(%arg0: i32) -> (i32, i32) {
    %c0_i32 = arith.constant 0 : i32
    %c0_i32_0 = arith.constant 0 : i32
    %c0_i32_1 = arith.constant 0 : i32
    return %c0_i32, %c0_i32_0 : i32, i32
  }
  func.func @transform_3(%arg0: i32) -> (i32, i32) {
    %c0_i32 = arith.constant 0 : i32
    %c0_i32_0 = arith.constant 0 : i32
    return %arg0, %c0_i32 : i32, i32
  }
}

</mosaic_0001>

<bundles_post_ra>
// kernel: tpu_custom_call.1
= control target key start
LH: loop header
LB: loop body
LE: loop exit
PB: predicated region body
PF: predicated region fallthrough
CT: control target
= control target key end

     0   :  { %v698_v3 = vmov 0.0|0.0   ;;  %vm699_vm0 = vmmov 0   ;;  %v700_v10 = vmov 0.0   ;;  %vm23_vm1 = vcmask 261120   ;;  %s770_s0 = inlined_call_operand.vmem [shape: f32[1,32], index: 0, kind: input, shape index: {}]   ;;  %s771_s1 = inlined_call_operand.vmem [shape: f32[32,8], index: 1, kind: input, shape index: {}]   ;;  %s772_s2 = inlined_call_operand.<no memory space> [shape: f32[1,1], index: 2, kind: input, shape index: {}]   ;;  %s773_s3 = inlined_call_operand.hbm [shape: f32[1,8], index: 3, kind: output, shape index: {}]  }
   0x1   :  { %v17_v0 = vld [vmem:[%s771_s1] sm:$0xff]  ;;  %v18_v1 = vld [vmem:[%s771_s1 + $0x8] sm:$0xff]  ;;  %v19_v2 = vld [vmem:[%s771_s1 + $0x10] sm:$0xff]  ;;  %624 = vmatprep.subr.bf16.mxu1 %v698_v3  ;;  %642 = vmatprep.subr.bf16.mxu0 %v698_v3 }
   0x2   :  { %v28_v4 = vand.u32 4294901760, %v17_v0  ;;  %v31_v5 = vand.u32 4294901760, %v18_v1  ;;  %v20_v6 = vld [vmem:[%s771_s1 + $0x18] sm:$0xff]  ;;  %v34_v7 = vand.u32 4294901760, %v19_v2  ;;  %v16_v8 = vld [vmem:[%s770_s0] sm:$0x1]  ;;  %566 = vmatprep.mubr.msk.f32.mxu1 %vm699_vm0, %v700_v10  ;;  %599 = vmatprep.mubr.msk.f32.mxu0 %vm699_vm0, %v700_v10 }
   0x3   :  { %v37_v9 = vand.u32 4294901760, %v20_v6 }
   0x4   :  { %9 = vsyncpa [#allocation4], 0  ;;  %v625_v11 = vpack.c.bf16 %v31_v5, %v28_v4  ;;  %v108_v12 = vsub.f32 %v17_v0, %v28_v4  ;;  %v115_v13 = vsub.f32 %v18_v1, %v31_v5  ;;  %v122_v14 = vsub.f32 %v19_v2, %v34_v7  ;;  %s701_s22 = smov [#allocation3]  }
   0x5   :  { %v628_v15 = vpack.c.bf16 %v37_v9, %v34_v7  ;;  %v129_v16 = vsub.f32 %v20_v6, %v37_v9  ;;  %v25_v17 = vsel %vm23_vm1, %v16_v8, 0  ;;  %v22_v42 = vstv %s772_s2  ;;  %s520_s23 = sshll.u32 %s701_s22, 4  ;;  %s521_s23 = int_to_ptr.vmem [resolvable:$true] %s520_s23 }
   0x6   :  { %626 = vmatpush3.bf16.msra.mxu1 %v625_v11  ;;  %644 = vmatpush3.bf16.msra.mxu0 %v625_v11  ;;  %v96_v18 = vand.u32 4294901760, %v25_v17  ;;  %v109_v19 = vand.u32 4294901760, %v108_v12  ;;  %v116_v20 = vand.u32 4294901760, %v115_v13  ;;  %v123_v21 = vand.u32 4294901760, %v122_v14  ;;  %s674_s24 = scalar_lea.vmem %s521_s23, 16  ;;  %s678_s25 = scalar_lea.vmem %s521_s23, 32 }
   0x7   :  { %627 = vmatprep.subr.bf16.mxu1 %v698_v3  ;;  %645 = vmatprep.subr.bf16.mxu0 %v698_v3  ;;  %v130_v22 = vand.u32 4294901760, %v129_v16  ;;  %v637_v39 = vpack.c.bf16 %v115_v13, %v108_v12  ;;  %v640_v40 = vpack.c.bf16 %v129_v16, %v122_v14  ;;  %vm512_vm2 = vcmask 57344   ;;  %p675_p0 = scmp.ne.s32.totalorder %s521_s23, %s674_s24  ;;  %p679_p1 = scmp.lt.s32.totalorder %s521_s23, %s521_s23 }
   0x8   :  { %v97_v23 = vsub.f32 %v25_v17, %v96_v18  ;;  %v110_v24 = vsub.f32 %v108_v12, %v109_v19  ;;  %v117_v25 = vsub.f32 %v115_v13, %v116_v20  ;;  %v124_v26 = vsub.f32 %v122_v14, %v123_v21  ;;  %p680_p2 = scmp.lt.s32.totalorder %s678_s25, %s674_s24 }
   0x9   :  { %v131_v27 = vsub.f32 %v129_v16, %v130_v22  ;;  %v649_v31 = vpack.c.bf16 %v116_v20, %v109_v19  ;;  %v652_v37 = vpack.c.bf16 %v130_v22, %v123_v21 }
   0xa   :  { %629 = vmatpush3.bf16.msra.mxu1 %v628_v15  ;;  %647 = vmatpush3.bf16.msra.mxu0 %v628_v15  ;;  %v98_v28 = vand.u32 4294901760, %v97_v23  ;;  %v111_v29 = vand.u32 4294901760, %v110_v24  ;;  %v118_v30 = vand.u32 4294901760, %v117_v25  ;;  %v125_v34 = vand.u32 4294901760, %v124_v26  ;;  %p681_p3 = por %p680_p2, %p679_p1 }
   0xb   :  { %630 = vmatprep.subr.bf16.mxu1 %v698_v3  ;;  %648 = vmatprep.subr.bf16.mxu0 %v698_v3  ;;  %v132_v35 = vand.u32 4294901760, %v131_v27 }
   0xc   :  { %v99_v32 = vsub.f32 %v97_v23, %v98_v28  ;;  %v631_v33 = vpack.c.bf16 %v118_v30, %v111_v29  ;;  %p682_p4 = pnand %p681_p3, %p675_p0 }
   0xd   :  { %600 = vmatmul.mubr.f32.vlgmr.msra.gmra.mrb[0].mxu0 %v98_v28  ;;  %v634_v38 = vpack.c.bf16 %v132_v35, %v125_v34 }
   0xe   :  { %v100_v36 = vand.u32 4294901760, %v99_v32  ;;  %650 = vmatpush3.bf16.msra.mxu0 %v649_v31  ;;  %610 = vmatprep.mubr.msk.f32.mxu0 %vm699_vm0, %v700_v10 }
   0xf   :  { %651 = vmatprep.subr.bf16.mxu0 %v698_v3 }
  0x10   :  { %567 = vmatmul.mubr.f32.vlgmr.msra.gmra.mrb[0].mxu1 %v100_v36 }
  0x11   :  { %632 = vmatpush3.bf16.msra.mxu1 %v631_v33  ;;  %577 = vmatprep.mubr.msk.f32.mxu1 %vm699_vm0, %v700_v10 }
  0x12   :  { %633 = vmatprep.subr.bf16.mxu1 %v698_v3  ;;  %653 = vmatpush3.bf16.msra.mxu0 %v652_v37 }
  0x13   :  { %654 = vmatprep.subr.bf16.mxu0 %v698_v3 }
  0x15   :  { %635 = vmatpush3.bf16.msra.mxu1 %v634_v38  ;;  %611 = vmatmul.mubr.f32.vlgmr.msra.gmra.mrb[0].mxu0 %v96_v18 }
  0x16   :  { %636 = vmatprep.subr.bf16.mxu1 %v698_v3  ;;  %656 = vmatpush3.bf16.msra.mxu0 %v625_v11 }
  0x17   :  { %657 = vmatprep.subr.bf16.mxu0 %v698_v3  ;;  %621 = vmatprep.mubr.msk.f32.mxu0 %vm699_vm0, %v700_v10 }
  0x18   :  { %578 = vmatmul.mubr.f32.vlgmr.msra.gmra.mrb[0].mxu1 %v96_v18 }
  0x19   :  { %638 = vmatpush3.bf16.msra.mxu1 %v637_v39  ;;  %588 = vmatprep.mubr.msk.f32.mxu1 %vm699_vm0, %v700_v10 }
  0x1a   :  { %639 = vmatprep.subr.bf16.mxu1 %v698_v3  ;;  %659 = vmatpush3.bf16.msra.mxu0 %v628_v15 }
  0x1d   :  { %641 = vmatpush3.bf16.msra.mxu1 %v640_v40  ;;  %622 = vmatmul.mubr.f32.vlgmr.msra.gmra.mrb[0].mxu0 %v96_v18 }
  0x20   :  { %589 = vmatmul.mubr.f32.vlgmr.msra.gmra.mrb[0].mxu1 %v97_v23 }
  0xf0   :  { %v508_v41 = vpop.f32.mrb[0].mxu0 }
  0xf1   :  { %v623_v43 = vpop.f32.mrb[1].mxu0 }
  0xf3   :  { %v273_v44 = vpop.f32.mrb[0].mxu1 }
  0xf4   :  { %v660_v45 = vadd.f32 %v273_v44, %v22_v42  ;;  %v590_v46 = vpop.f32.mrb[1].mxu1 }
  0xf6   :  { %v661_v47 = vadd.f32 %v660_v45, %v508_v41 }
  0xf8   :  { %513 = vst.msk [vmem:[#allocation3] sm:$0x1] %vm512_vm2, %v661_v47 }
  0xf9   :  { %685 = shalt.err (!%p682_p4)
}
  0xfa   :  { %s686_s27 = scalar_lea.hbm %s773_s3, 16 }
  0xfb   :  { %p687_p5 = scmp.ne.s32.totalorder %s773_s3, %s686_s27  ;;  %p690_p6 = scmp.lt.u32.totalorder %s686_s27, %s773_s3 }
  0xfd   :  { %p692_p7 = pnand %p690_p6, %p687_p5 }
  0xff   :  { %695 = shalt.err (!%p692_p7)
}
 0x100   :  { %523 = dma.vmem_to_hbm [thread:$0]  %s521_s23, 16, %s773_s3, [#allocation4]  }
 0x101   :  { %696 = dma.done.wait [#allocation4], 16  }
 0x102   :  { %697 = vsyncadd [#allocation4], 4294967280 }
 0x103   :  { %527 = vsyncpa [#allocation4], 1 }

</bundles_post_ra>
